<compile_context>
chip_gen: v6e
topology: v6e:2x2x1
jax: 0.10.0
libtpu: 0.0.40
codegen_flags: <defaults>
</compile_context>

<pallas_src>
import functools

import jax
import jax.numpy as jnp
import numpy as np
from jax.experimental import pallas as pl
from jax.experimental.pallas import tpu as pltpu

BN_EPS = 1e-5
TILE_B = 1024                    # batch tile for the tiled (large-batch) path
FUSED_MAX_B = 2048               # largest batch kept on the fused gridless path
MATMUL_DTYPE = jnp.bfloat16      # MXU operand dtype (accumulation stays f32)
H2_DTYPE = jnp.bfloat16          # dtype of the h2 HBM round trip (tiled path)
VMEM_LIMIT_BYTES = 48 * 1024 * 1024   # < v7x physical 64 MiB, > v5e default 16 MiB


# --------------------------------------------------------------------------- #
# Shared in-kernel math
# --------------------------------------------------------------------------- #
def _mm(a, w):
    """Matmul on the MXU: operands in the weight's dtype, f32 accumulate."""
    return jnp.dot(a.astype(w.dtype), w, preferred_element_type=jnp.float32)


def _encode_h2(x, w1, b1, w2, b2):
    """x -> relu(linear) -> (dropout=identity) -> relu(linear), pre-BatchNorm."""
    h1 = jnp.maximum(_mm(x, w1) + b1, 0.0)
    # dropout -> identity (see TODO at top of file)
    h2 = jnp.maximum(_mm(h1, w2) + b2, 0.0)
    return h2


def _project_and_decode(x, wgt, eps, h2n,
                        wmv, bmv, wd1, bd1, wd2, bd2, wd3, bd3, zp):
    """Post-BN head: fused lane-aligned mu|log_var projection, reparam, decode,
    per-sample losses.

    zp is the lane-aligned (>=128) latent width; columns [z_dim:zp) of the
    projection are zero-padded so mu=0, log_var=0, std=1 there -> exactly 0
    contribution to KL and z.
    Returns (x_reconst, weighted per-sample BCE (B,1), per-sample KL (B,1)).
    """
    mv = _mm(h2n, wmv) + bmv            # (B, 2*zp); split lands on a vreg edge
    mu = mv[:, :zp]
    log_var = jnp.clip(mv[:, zp:], -16.0, 16.0)

    # reparameterize
    std = jnp.exp(log_var * 0.5)
    z = mu + eps * std                  # eps zero-padded to width zp

    # decode (wd1 rows beyond z_dim are zero, so padded z lanes are inert)
    hd1 = jnp.maximum(_mm(z, wd1) + bd1, 0.0)
    # dropout -> identity (see TODO at top of file)
    hd2 = jnp.maximum(_mm(hd1, wd2) + bd2, 0.0)
    x_reconst = _mm(hd2, wd3) + bd3

    # KL per sample; exp(log_var) == std*std (reuses the reparam exp).
    # NOTE: the reference computes KL from the unclamped log_var; the clamp
    # only matters for |log_var| > 16 (pathological).
    kls = -0.5 * jnp.sum(1.0 + log_var - mu * mu - std * std,
                         axis=1, keepdims=True)

    # BCE from logits: max(l,0) - l*x + log(1 + exp(-|l|)).
    # exp(-|l|) is in (0, 1], so log(1+t) here is accurate; log1p only differs
    # when t < ~1e-7, where the term is negligible vs the other BCE terms
    # (and torch's own -100 log clamp kicks in anyway).
    l = x_reconst
    bce = jnp.maximum(l, 0.0) - l * x + jnp.log(1.0 + jnp.exp(-jnp.abs(l)))
    wbce = jnp.sum(bce, axis=1, keepdims=True) * wgt
    return x_reconst, wbce, kls


def _valid_rows(tb, true_b):
    """(tb, 1) bool mask: global row index < true (unpadded) batch size."""
    row = pl.program_id(0) * tb + jax.lax.broadcasted_iota(jnp.int32, (tb, 1), 0)
    return row < true_b


# --------------------------------------------------------------------------- #
# Kernels
# --------------------------------------------------------------------------- #
def _vae_fused_kernel(
    x_ref, wgt_ref, eps_ref,
    w1_ref, b1_ref, w2_ref, b2_ref, gamma_ref, beta_ref, wmv_ref, bmv_ref,
    wd1_ref, bd1_ref, wd2_ref, bd2_ref, wd3_ref, bd3_ref,
    xr_ref, rl_ref, kl_ref,
    *, zp,
):
    """Small/medium-batch path: whole forward + losses in one gridless kernel."""
    x = x_ref[...]
    h2 = _encode_h2(x, w1_ref[...], b1_ref[...], w2_ref[...], b2_ref[...])

    # BatchNorm1d, training-mode batch statistics (biased variance), f32.
    mean = jnp.mean(h2, axis=0, keepdims=True)
    var = jnp.mean((h2 - mean) ** 2, axis=0, keepdims=True)
    h2n = gamma_ref[...] * (h2 - mean) * jax.lax.rsqrt(var + BN_EPS) + beta_ref[...]

    xr, wbce, kls = _project_and_decode(
        x, wgt_ref[...], eps_ref[...], h2n,
        wmv_ref[...], bmv_ref[...],
        wd1_ref[...], bd1_ref[...], wd2_ref[...], bd2_ref[...],
        wd3_ref[...], bd3_ref[...], zp)

    xr_ref[...] = xr
    rl_ref[...] = jnp.sum(wbce).reshape(1, 1)
    kl_ref[...] = jnp.sum(kls).reshape(1, 1)


def _encode_kernel(x_ref, w1_ref, b1_ref, w2_ref, b2_ref,
                   h2_ref, sum_ref, ssq_ref, *, tb, true_b):
    """Tiled pass 1: encoder to pre-BN h2 + per-tile BN partial sums."""
    h2 = _encode_h2(
        x_ref[...], w1_ref[...], b1_ref[...], w2_ref[...], b2_ref[...])
    # Mask padded rows out of the BatchNorm statistics (stats stay f32-exact).
    h2m = jnp.where(_valid_rows(tb, true_b), h2, 0.0)
    sum_ref[...] = jnp.sum(h2m, axis=0, keepdims=True)[None]
    ssq_ref[...] = jnp.sum(h2m * h2m, axis=0, keepdims=True)[None]
    h2_ref[...] = h2.astype(h2_ref.dtype)


def _bn_decode_kernel(
    x_ref, wgt_ref, eps_ref, h2_ref, scale_ref, shift_ref,
    wmv_ref, bmv_ref, wd1_ref, bd1_ref, wd2_ref, bd2_ref, wd3_ref, bd3_ref,
    xr_ref, loss_ref,
    *, zp, tb, true_b,
):
    """Tiled pass 2: whole-batch BN (folded scale/shift) + head for one tile.

    Losses are reduced to two per-tile scalars written into a lane-dense
    (1, 1, 128) block: lane 0 = weighted BCE sum, lane 1 = KL sum.
    """
    h2n = h2_ref[...].astype(jnp.float32) * scale_ref[...] + shift_ref[...]
    xr, wbce, kls = _project_and_decode(
        x_ref[...], wgt_ref[...], eps_ref[...], h2n,
        wmv_ref[...], bmv_ref[...],
        wd1_ref[...], bd1_ref[...], wd2_ref[...], bd2_ref[...],
        wd3_ref[...], bd3_ref[...], zp)
    xr_ref[...] = xr

    valid = _valid_rows(tb, true_b)
    rl_tile = jnp.sum(jnp.where(valid, wbce, 0.0))
    kl_tile = jnp.sum(jnp.where(valid, kls, 0.0))
    lane = jax.lax.broadcasted_iota(jnp.int32, (1, 128), 1)
    loss_ref[...] = jnp.where(lane == 0, rl_tile,
                              jnp.where(lane == 1, kl_tile, 0.0)).reshape(1, 1, 128)


# --------------------------------------------------------------------------- #
# Wrappers
# --------------------------------------------------------------------------- #
def _vae_forward_fused(x, weights, eps_p, w1, b1, w2, b2, gamma, beta,
                       wmv, bmv, wd1, bd1, wd2, bd2, wd3, bd3, zp):
    B, input_dim = x.shape
    vmem = pl.BlockSpec(memory_space=pltpu.MemorySpace.VMEM)
    ins = (x, weights, eps_p, w1, b1, w2, b2, gamma, beta, wmv, bmv,
           wd1, bd1, wd2, bd2, wd3, bd3)
    out_shapes = (
        jax.ShapeDtypeStruct((B, input_dim), jnp.float32),  # x_reconst
        jax.ShapeDtypeStruct((1, 1), jnp.float32),          # reconst_loss
        jax.ShapeDtypeStruct((1, 1), jnp.float32),          # kl_div
    )
    xr, rl, kl = pl.pallas_call(
        functools.partial(_vae_fused_kernel, zp=zp),
        out_shape=out_shapes,
        in_specs=[vmem] * len(ins),
        out_specs=(vmem, vmem, vmem),
        compiler_params=pltpu.CompilerParams(vmem_limit_bytes=VMEM_LIMIT_BYTES),
    )(*ins)
    return xr, rl[0, 0], kl[0, 0]


def _vae_forward_tiled(x, weights, eps_p, w1, b1, w2, b2, gamma, beta,
                       wmv, bmv, wd1, bd1, wd2, bd2, wd3, bd3, zp, tb):
    B, input_dim = x.shape
    enc_dim2 = w2.shape[1]
    nb = pl.cdiv(B, tb)
    Bp = nb * tb
    if Bp != B:  # pad batch to a tile multiple; padded rows are masked in-kernel
        pad = Bp - B
        x = jnp.pad(x, ((0, pad), (0, 0)))
        weights = jnp.pad(weights, ((0, pad), (0, 0)))
        eps_p = jnp.pad(eps_p, ((0, pad), (0, 0)))

    def full(a):   # whole-array block, resident across all grid steps
        return pl.BlockSpec(a.shape, lambda i, _nd=a.ndim: (0,) * _nd)

    def row(d):    # one batch tile of a (Bp, d) array
        return pl.BlockSpec((tb, d), lambda i: (i, 0))

    cparams = pltpu.CompilerParams(dimension_semantics=("parallel",),
                                   vmem_limit_bytes=VMEM_LIMIT_BYTES)

    # --- pass 1: encoder to pre-BN h2 + per-tile BN partial sums -------------
    h2, h2_sum, h2_ssq = pl.pallas_call(
        functools.partial(_encode_kernel, tb=tb, true_b=B),
        out_shape=(jax.ShapeDtypeStruct((Bp, enc_dim2), H2_DTYPE),
                   jax.ShapeDtypeStruct((nb, 1, enc_dim2), jnp.float32),
                   jax.ShapeDtypeStruct((nb, 1, enc_dim2), jnp.float32)),
        grid=(nb,),
        in_specs=[row(input_dim), full(w1), full(b1), full(w2), full(b2)],
        out_specs=(row(enc_dim2),
                   pl.BlockSpec((1, 1, enc_dim2), lambda i: (i, 0, 0)),
                   pl.BlockSpec((1, 1, enc_dim2), lambda i: (i, 0, 0))),
        compiler_params=cparams,
    )(x, w1, b1, w2, b2)

    # --- whole-batch BN statistics from the tiny per-tile partial sums -------
    s1 = jnp.sum(h2_sum[:, 0, :], axis=0, keepdims=True)   # (1, enc_dim2)
    s2 = jnp.sum(h2_ssq[:, 0, :], axis=0, keepdims=True)
    mean = s1 / B
    var = jnp.maximum(s2 / B - mean * mean, 0.0)            # biased (train mode)
    scale = gamma * jax.lax.rsqrt(var + BN_EPS)
    shift = beta - mean * scale

    # --- pass 2: BN + fused projection + reparam + decode + per-tile losses --
    xr, loss = pl.pallas_call(
        functools.partial(_bn_decode_kernel, zp=zp, tb=tb, true_b=B),
        out_shape=(jax.ShapeDtypeStruct((Bp, input_dim), jnp.float32),
                   jax.ShapeDtypeStruct((nb, 1, 128), jnp.float32)),
        grid=(nb,),
        in_specs=[row(input_dim), row(1), row(zp), row(enc_dim2),
                  full(scale), full(shift),
                  full(wmv), full(bmv),
                  full(wd1), full(bd1), full(wd2), full(bd2),
                  full(wd3), full(bd3)],
        out_specs=(row(input_dim),
                   pl.BlockSpec((1, 1, 128), lambda i: (i, 0, 0))),
        compiler_params=cparams,
    )(x, weights, eps_p, h2, scale, shift, wmv, bmv,
      wd1, bd1, wd2, bd2, wd3, bd3)

    return xr[:B], jnp.sum(loss[:, 0, 0]), jnp.sum(loss[:, 0, 1])


@functools.partial(jax.jit, static_argnames=("batch_tile", "fused_max_batch"))
def vae_forward(x, weights, eps, params, *, batch_tile=TILE_B,
                fused_max_batch=FUSED_MAX_B):
    """Returns (x_reconst, reconst_loss, kl_div)."""
    B, _ = x.shape
    z_dim = eps.shape[1]
    zp = ((z_dim + 127) // 128) * 128          # lane-aligned latent width (>=128)
    mm_dt = MATMUL_DTYPE

    # Lane-aligned fused mu|log_var projection: [ W3 | 0-pad | Wv | 0-pad ].
    w3p = jnp.pad(params["w3"], ((0, 0), (0, zp - z_dim)))
    wvp = jnp.pad(params["wv"], ((0, 0), (0, zp - z_dim)))
    wmv = jnp.concatenate([w3p, wvp], axis=1).astype(mm_dt)
    b3p = jnp.pad(params["b3"], ((0, 0), (0, zp - z_dim)))
    bvp = jnp.pad(params["bv"], ((0, 0), (0, zp - z_dim)))
    bmv = jnp.concatenate([b3p, bvp], axis=1)

    # Zero-pad decoder input rows and the noise to the padded latent width.
    wd1 = jnp.pad(params["wd1"], ((0, zp - z_dim), (0, 0))).astype(mm_dt)
    eps_p = jnp.pad(eps, ((0, 0), (0, zp - z_dim)))

    w1, b1 = params["w1"].astype(mm_dt), params["b1"]
    w2, b2 = params["w2"].astype(mm_dt), params["b2"]
    bd1 = params["bd1"]
    wd2, bd2 = params["wd2"].astype(mm_dt), params["bd2"]
    wd3, bd3 = params["wd3"].astype(mm_dt), params["bd3"]
    gamma, beta = params["gamma"], params["beta"]

    args = (x, weights, eps_p, w1, b1, w2, b2, gamma, beta, wmv, bmv,
            wd1, bd1, wd2, bd2, wd3, bd3)
    if B <= fused_max_batch:
        return _vae_forward_fused(*args, zp)
    return _vae_forward_tiled(*args, zp, batch_tile)


# --------------------------------------------------------------------------- #
# Pure-JAX f32 reference (mirrors the PyTorch module) for validation
# --------------------------------------------------------------------------- #
def vae_forward_ref(x, weights, eps, params):
    h1 = jax.nn.relu(x @ params["w1"] + params["b1"])
    h2 = jax.nn.relu(h1 @ params["w2"] + params["b2"])
    mean = jnp.mean(h2, axis=0, keepdims=True)
    var = jnp.mean((h2 - mean) ** 2, axis=0, keepdims=True)
    h2n = params["gamma"] * (h2 - mean) / jnp.sqrt(var + BN_EPS) + params["beta"]
    mu = h2n @ params["w3"] + params["b3"]
    log_var = h2n @ params["wv"] + params["bv"]
    lv_c = jnp.clip(log_var, -16.0, 16.0)
    z = mu + eps * jnp.exp(lv_c / 2)
    hd1 = jax.nn.relu(z @ params["wd1"] + params["bd1"])
    hd2 = jax.nn.relu(hd1 @ params["wd2"] + params["bd2"])
    x_reconst = hd2 @ params["wd3"] + params["bd3"]
    p = jnp.clip(jax.nn.sigmoid(x_reconst), 1e-12, 1.0 - 1e-12)
    bce = -(x * jnp.log(p) + (1.0 - x) * jnp.log(1.0 - p))
    reconst = jnp.sum(jnp.sum(bce, axis=1, keepdims=True) * weights)
    kl = -0.5 * jnp.sum(1.0 + log_var - mu ** 2 - jnp.exp(log_var))
    return x_reconst, reconst, kl


# --------------------------------------------------------------------------- #
# Parameter construction (mimics torch.nn.Linear default init)
# --------------------------------------------------------------------------- #
def _init_linear(key, fan_in, fan_out):
    kw, kb = jax.random.split(key)
    bound = 1.0 / jnp.sqrt(jnp.float32(fan_in))
    w = jax.random.uniform(kw, (fan_in, fan_out), jnp.float32, -bound, bound)
    b = jax.random.uniform(kb, (1, fan_out), jnp.float32, -bound, bound)
    return w, b


def make_params(key, input_dim, enc_dim1, enc_dim2, z_dim, dec_dim1, dec_dim2):
    keys = jax.random.split(key, 8)
    p = {}
    p["w1"], p["b1"] = _init_linear(keys[0], input_dim, enc_dim1)
    p["w2"], p["b2"] = _init_linear(keys[1], enc_dim1, enc_dim2)
    p["gamma"] = jnp.ones((1, enc_dim2), jnp.float32)
    p["beta"] = jnp.zeros((1, enc_dim2), jnp.float32)
    p["w3"], p["b3"] = _init_linear(keys[2], enc_dim2, z_dim)
    p["wv"], p["bv"] = _init_linear(keys[3], enc_dim2, z_dim)
    p["wd1"], p["bd1"] = _init_linear(keys[4], z_dim, dec_dim1)
    p["wd2"], p["bd2"] = _init_linear(keys[5], dec_dim1, dec_dim2)
    p["wd3"], p["bd3"] = _init_linear(keys[6], dec_dim2, input_dim)
    return p


if __name__ == "__main__":
    # Config consistent with the module: input_dim = sites * 12
    sites = 16
    input_dim = sites * 12          # 192
    enc_dim1, enc_dim2 = 64, 32
    z_dim = 16
    dec_dim1, dec_dim2 = 32, 64

    root = jax.random.PRNGKey(0)
    k_x, k_w, k_eps, k_params, k_x2, k_w2, k_eps2 = jax.random.split(root, 7)
    params = make_params(
        k_params, input_dim, enc_dim1, enc_dim2, z_dim, dec_dim1, dec_dim2)

    # --- small batch -> single fused gridless kernel -------------------------
    B = 8
    x = jax.random.uniform(k_x, (B, input_dim), jnp.float32)   # BCE targets in [0,1]
    weights = jax.random.uniform(k_w, (B, 1), jnp.float32)     # per-sample loss weights
    eps = jax.random.normal(k_eps, (B, z_dim), jnp.float32)    # reparameterization noise
    xr, rl, kl = vae_forward(x, weights, eps, params)
    jax.block_until_ready((xr, rl, kl))
    xr_r, rl_r, kl_r = vae_forward_ref(x, weights, eps, params)
    np.testing.assert_allclose(np.asarray(xr), np.asarray(xr_r), rtol=0.1, atol=0.08)
    np.testing.assert_allclose(float(rl), float(rl_r), rtol=0.1)
    np.testing.assert_allclose(float(kl), float(kl_r), rtol=0.1)

    # --- large, non-tile-aligned batch -> padded batch-tiled two-pass path ---
    Bb = 2 * TILE_B + 500           # exercises the pad/mask handling
    xb = jax.random.uniform(k_x2, (Bb, input_dim), jnp.float32)
    wb = jax.random.uniform(k_w2, (Bb, 1), jnp.float32)
    eb = jax.random.normal(k_eps2, (Bb, z_dim), jnp.float32)
    xrb, rlb, klb = vae_forward(xb, wb, eb, params)
    jax.block_until_ready((xrb, rlb, klb))
    xrb_r, rlb_r, klb_r = vae_forward_ref(xb, wb, eb, params)
    np.testing.assert_allclose(np.asarray(xrb), np.asarray(xrb_r), rtol=0.1, atol=0.08)
    np.testing.assert_allclose(float(rlb), float(rlb_r), rtol=0.1)
    np.testing.assert_allclose(float(klb), float(klb_r), rtol=0.1)

    print("KERNEL_OK")
</pallas_src>

<mosaic_0001>
module attributes {stable_mosaic.version = 11 : i64} {
  func.func @_vae_fused_kernel(%arg0: memref<8x192xf32, #tpu.memory_space<vmem>>, %arg1: memref<8x1xf32, #tpu.memory_space<vmem>>, %arg2: memref<8x128xf32, #tpu.memory_space<vmem>>, %arg3: memref<192x64xbf16, #tpu.memory_space<vmem>>, %arg4: memref<1x64xf32, #tpu.memory_space<vmem>>, %arg5: memref<64x32xbf16, #tpu.memory_space<vmem>>, %arg6: memref<1x32xf32, #tpu.memory_space<vmem>>, %arg7: memref<1x32xf32, #tpu.memory_space<vmem>>, %arg8: memref<1x32xf32, #tpu.memory_space<vmem>>, %arg9: memref<32x256xbf16, #tpu.memory_space<vmem>>, %arg10: memref<1x256xf32, #tpu.memory_space<vmem>>, %arg11: memref<128x32xbf16, #tpu.memory_space<vmem>>, %arg12: memref<1x32xf32, #tpu.memory_space<vmem>>, %arg13: memref<32x64xbf16, #tpu.memory_space<vmem>>, %arg14: memref<1x64xf32, #tpu.memory_space<vmem>>, %arg15: memref<64x192xbf16, #tpu.memory_space<vmem>>, %arg16: memref<1x192xf32, #tpu.memory_space<vmem>>, %arg17: memref<8x192xf32, #tpu.memory_space<vmem>>, %arg18: memref<1x1xf32, #tpu.memory_space<vmem>>, %arg19: memref<1x1xf32, #tpu.memory_space<vmem>>) attributes {dimension_semantics = [], scalar_prefetch = 0 : i64, scratch_operands = 0 : i64, tpu.core_type = #tpu.core_type<tc>} {
    %c0 = arith.constant 0 : index
    %c0_0 = arith.constant 0 : index
    %0 = vector.load %arg0[%c0, %c0_0] : memref<8x192xf32, #tpu.memory_space<vmem>>, vector<8x192xf32>
    %c0_1 = arith.constant 0 : index
    %c0_2 = arith.constant 0 : index
    %1 = vector.load %arg3[%c0_1, %c0_2] : memref<192x64xbf16, #tpu.memory_space<vmem>>, vector<192x64xbf16>
    %c0_3 = arith.constant 0 : index
    %c0_4 = arith.constant 0 : index
    %2 = vector.load %arg4[%c0_3, %c0_4] : memref<1x64xf32, #tpu.memory_space<vmem>>, vector<1x64xf32>
    %c0_5 = arith.constant 0 : index
    %c0_6 = arith.constant 0 : index
    %3 = vector.load %arg5[%c0_5, %c0_6] : memref<64x32xbf16, #tpu.memory_space<vmem>>, vector<64x32xbf16>
    %c0_7 = arith.constant 0 : index
    %c0_8 = arith.constant 0 : index
    %4 = vector.load %arg6[%c0_7, %c0_8] : memref<1x32xf32, #tpu.memory_space<vmem>>, vector<1x32xf32>
    %5 = arith.truncf %0 : vector<8x192xf32> to vector<8x192xbf16>
    %cst = arith.constant dense<0.000000e+00> : vector<8x64xf32>
    %6 = tpu.matmul %5, %1, %cst {dimension_numbers = #tpu.dot_dimension_numbers<[1], [0], [0], [1], [0, 0, 1, 1], [], []>} : vector<8x192xbf16>, vector<192x64xbf16>, vector<8x64xf32> -> vector<8x64xf32>
    %7 = vector.broadcast %2 : vector<1x64xf32> to vector<8x64xf32>
    %8 = arith.addf %6, %7 : vector<8x64xf32>
    %cst_9 = arith.constant 0.000000e+00 : f32
    %9 = vector.broadcast %cst_9 : f32 to vector<8x64xf32>
    %10 = arith.maximumf %8, %9 : vector<8x64xf32>
    %11 = arith.truncf %10 : vector<8x64xf32> to vector<8x64xbf16>
    %cst_10 = arith.constant dense<0.000000e+00> : vector<8x32xf32>
    %12 = tpu.matmul %11, %3, %cst_10 {dimension_numbers = #tpu.dot_dimension_numbers<[1], [0], [0], [1], [0, 0, 1, 1], [], []>} : vector<8x64xbf16>, vector<64x32xbf16>, vector<8x32xf32> -> vector<8x32xf32>
    %13 = vector.broadcast %4 : vector<1x32xf32> to vector<8x32xf32>
    %14 = arith.addf %12, %13 : vector<8x32xf32>
    %cst_11 = arith.constant 0.000000e+00 : f32
    %15 = vector.broadcast %cst_11 : f32 to vector<8x32xf32>
    %16 = arith.maximumf %14, %15 : vector<8x32xf32>
    %cst_12 = arith.constant dense<0.000000e+00> : vector<32xf32>
    %17 = vector.multi_reduction <add>, %16, %cst_12 [0] : vector<8x32xf32> to vector<32xf32>
    %18 = vector.shape_cast %17 : vector<32xf32> to vector<1x32xf32>
    %cst_13 = arith.constant 8.000000e+00 : f32
    %19 = vector.broadcast %cst_13 : f32 to vector<1x32xf32>
    %20 = arith.divf %18, %19 : vector<1x32xf32>
    %21 = vector.broadcast %20 : vector<1x32xf32> to vector<8x32xf32>
    %22 = arith.subf %16, %21 : vector<8x32xf32>
    %23 = arith.mulf %22, %22 : vector<8x32xf32>
    %cst_14 = arith.constant dense<0.000000e+00> : vector<32xf32>
    %24 = vector.multi_reduction <add>, %23, %cst_14 [0] : vector<8x32xf32> to vector<32xf32>
    %25 = vector.shape_cast %24 : vector<32xf32> to vector<1x32xf32>
    %cst_15 = arith.constant 8.000000e+00 : f32
    %26 = vector.broadcast %cst_15 : f32 to vector<1x32xf32>
    %27 = arith.divf %25, %26 : vector<1x32xf32>
    %c0_16 = arith.constant 0 : index
    %c0_17 = arith.constant 0 : index
    %28 = vector.load %arg7[%c0_16, %c0_17] : memref<1x32xf32, #tpu.memory_space<vmem>>, vector<1x32xf32>
    %29 = vector.broadcast %20 : vector<1x32xf32> to vector<8x32xf32>
    %30 = arith.subf %16, %29 : vector<8x32xf32>
    %31 = vector.broadcast %28 : vector<1x32xf32> to vector<8x32xf32>
    %32 = arith.mulf %31, %30 : vector<8x32xf32>
    %cst_18 = arith.constant 9.99999974E-6 : f32
    %33 = vector.broadcast %cst_18 : f32 to vector<1x32xf32>
    %34 = arith.addf %27, %33 : vector<1x32xf32>
    %35 = math.rsqrt %34 : vector<1x32xf32>
    %36 = vector.broadcast %35 : vector<1x32xf32> to vector<8x32xf32>
    %37 = arith.mulf %32, %36 : vector<8x32xf32>
    %c0_19 = arith.constant 0 : index
    %c0_20 = arith.constant 0 : index
    %38 = vector.load %arg8[%c0_19, %c0_20] : memref<1x32xf32, #tpu.memory_space<vmem>>, vector<1x32xf32>
    %39 = vector.broadcast %38 : vector<1x32xf32> to vector<8x32xf32>
    %40 = arith.addf %37, %39 : vector<8x32xf32>
    %c0_21 = arith.constant 0 : index
    %c0_22 = arith.constant 0 : index
    %41 = vector.load %arg1[%c0_21, %c0_22] : memref<8x1xf32, #tpu.memory_space<vmem>>, vector<8x1xf32>
    %c0_23 = arith.constant 0 : index
    %c0_24 = arith.constant 0 : index
    %42 = vector.load %arg2[%c0_23, %c0_24] : memref<8x128xf32, #tpu.memory_space<vmem>>, vector<8x128xf32>
    %c0_25 = arith.constant 0 : index
    %c0_26 = arith.constant 0 : index
    %43 = vector.load %arg9[%c0_25, %c0_26] : memref<32x256xbf16, #tpu.memory_space<vmem>>, vector<32x256xbf16>
    %c0_27 = arith.constant 0 : index
    %c0_28 = arith.constant 0 : index
    %44 = vector.load %arg10[%c0_27, %c0_28] : memref<1x256xf32, #tpu.memory_space<vmem>>, vector<1x256xf32>
    %c0_29 = arith.constant 0 : index
    %c0_30 = arith.constant 0 : index
    %45 = vector.load %arg11[%c0_29, %c0_30] : memref<128x32xbf16, #tpu.memory_space<vmem>>, vector<128x32xbf16>
    %c0_31 = arith.constant 0 : index
    %c0_32 = arith.constant 0 : index
    %46 = vector.load %arg12[%c0_31, %c0_32] : memref<1x32xf32, #tpu.memory_space<vmem>>, vector<1x32xf32>
    %c0_33 = arith.constant 0 : index
    %c0_34 = arith.constant 0 : index
    %47 = vector.load %arg13[%c0_33, %c0_34] : memref<32x64xbf16, #tpu.memory_space<vmem>>, vector<32x64xbf16>
    %c0_35 = arith.constant 0 : index
    %c0_36 = arith.constant 0 : index
    %48 = vector.load %arg14[%c0_35, %c0_36] : memref<1x64xf32, #tpu.memory_space<vmem>>, vector<1x64xf32>
    %c0_37 = arith.constant 0 : index
    %c0_38 = arith.constant 0 : index
    %49 = vector.load %arg15[%c0_37, %c0_38] : memref<64x192xbf16, #tpu.memory_space<vmem>>, vector<64x192xbf16>
    %c0_39 = arith.constant 0 : index
    %c0_40 = arith.constant 0 : index
    %50 = vector.load %arg16[%c0_39, %c0_40] : memref<1x192xf32, #tpu.memory_space<vmem>>, vector<1x192xf32>
    %51 = arith.truncf %40 : vector<8x32xf32> to vector<8x32xbf16>
    %cst_41 = arith.constant dense<0.000000e+00> : vector<8x256xf32>
    %52 = tpu.matmul %51, %43, %cst_41 {dimension_numbers = #tpu.dot_dimension_numbers<[1], [0], [0], [1], [0, 0, 1, 1], [], []>} : vector<8x32xbf16>, vector<32x256xbf16>, vector<8x256xf32> -> vector<8x256xf32>
    %53 = vector.broadcast %44 : vector<1x256xf32> to vector<8x256xf32>
    %54 = arith.addf %52, %53 : vector<8x256xf32>
    %55 = vector.extract_strided_slice %54 {offsets = [0, 0], sizes = [8, 128], strides = [1, 1]} : vector<8x256xf32> to vector<8x128xf32>
    %56 = vector.extract_strided_slice %54 {offsets = [0, 128], sizes = [8, 128], strides = [1, 1]} : vector<8x256xf32> to vector<8x128xf32>
    %cst_42 = arith.constant -1.600000e+01 : f32
    %cst_43 = arith.constant 1.600000e+01 : f32
    %57 = vector.broadcast %cst_42 : f32 to vector<8x128xf32>
    %58 = arith.maximumf %57, %56 : vector<8x128xf32>
    %59 = vector.broadcast %cst_43 : f32 to vector<8x128xf32>
    %60 = arith.minimumf %59, %58 : vector<8x128xf32>
    %cst_44 = arith.constant 5.000000e-01 : f32
    %61 = vector.broadcast %cst_44 : f32 to vector<8x128xf32>
    %62 = arith.mulf %60, %61 : vector<8x128xf32>
    %63 = math.exp %62 : vector<8x128xf32>
    %64 = arith.mulf %42, %63 : vector<8x128xf32>
    %65 = arith.addf %55, %64 : vector<8x128xf32>
    %66 = arith.truncf %65 : vector<8x128xf32> to vector<8x128xbf16>
    %cst_45 = arith.constant dense<0.000000e+00> : vector<8x32xf32>
    %67 = tpu.matmul %66, %45, %cst_45 {dimension_numbers = #tpu.dot_dimension_numbers<[1], [0], [0], [1], [0, 0, 1, 1], [], []>} : vector<8x128xbf16>, vector<128x32xbf16>, vector<8x32xf32> -> vector<8x32xf32>
    %68 = vector.broadcast %46 : vector<1x32xf32> to vector<8x32xf32>
    %69 = arith.addf %67, %68 : vector<8x32xf32>
    %cst_46 = arith.constant 0.000000e+00 : f32
    %70 = vector.broadcast %cst_46 : f32 to vector<8x32xf32>
    %71 = arith.maximumf %69, %70 : vector<8x32xf32>
    %72 = arith.truncf %71 : vector<8x32xf32> to vector<8x32xbf16>
    %cst_47 = arith.constant dense<0.000000e+00> : vector<8x64xf32>
    %73 = tpu.matmul %72, %47, %cst_47 {dimension_numbers = #tpu.dot_dimension_numbers<[1], [0], [0], [1], [0, 0, 1, 1], [], []>} : vector<8x32xbf16>, vector<32x64xbf16>, vector<8x64xf32> -> vector<8x64xf32>
    %74 = vector.broadcast %48 : vector<1x64xf32> to vector<8x64xf32>
    %75 = arith.addf %73, %74 : vector<8x64xf32>
    %cst_48 = arith.constant 0.000000e+00 : f32
    %76 = vector.broadcast %cst_48 : f32 to vector<8x64xf32>
    %77 = arith.maximumf %75, %76 : vector<8x64xf32>
    %78 = arith.truncf %77 : vector<8x64xf32> to vector<8x64xbf16>
    %cst_49 = arith.constant dense<0.000000e+00> : vector<8x192xf32>
    %79 = tpu.matmul %78, %49, %cst_49 {dimension_numbers = #tpu.dot_dimension_numbers<[1], [0], [0], [1], [0, 0, 1, 1], [], []>} : vector<8x64xbf16>, vector<64x192xbf16>, vector<8x192xf32> -> vector<8x192xf32>
    %80 = vector.broadcast %50 : vector<1x192xf32> to vector<8x192xf32>
    %81 = arith.addf %79, %80 : vector<8x192xf32>
    %cst_50 = arith.constant 1.000000e+00 : f32
    %82 = vector.broadcast %cst_50 : f32 to vector<8x128xf32>
    %83 = arith.addf %82, %60 : vector<8x128xf32>
    %84 = arith.mulf %55, %55 : vector<8x128xf32>
    %85 = arith.subf %83, %84 : vector<8x128xf32>
    %86 = arith.mulf %63, %63 : vector<8x128xf32>
    %87 = arith.subf %85, %86 : vector<8x128xf32>
    %cst_51 = arith.constant dense<0.000000e+00> : vector<8xf32>
    %88 = vector.multi_reduction <add>, %87, %cst_51 [1] : vector<8x128xf32> to vector<8xf32>
    %89 = vector.shape_cast %88 : vector<8xf32> to vector<8x1xf32>
    %cst_52 = arith.constant -5.000000e-01 : f32
    %90 = vector.broadcast %cst_52 : f32 to vector<8x1xf32>
    %91 = arith.mulf %90, %89 : vector<8x1xf32>
    %cst_53 = arith.constant 0.000000e+00 : f32
    %92 = vector.broadcast %cst_53 : f32 to vector<8x192xf32>
    %93 = arith.maximumf %81, %92 : vector<8x192xf32>
    %94 = arith.mulf %81, %0 : vector<8x192xf32>
    %95 = arith.subf %93, %94 : vector<8x192xf32>
    %96 = math.absf %81 : vector<8x192xf32>
    %cst_54 = arith.constant 0.000000e+00 : f32
    %97 = vector.broadcast %cst_54 : f32 to vector<8x192xf32>
    %98 = arith.subf %97, %96 : vector<8x192xf32>
    %99 = math.exp %98 : vector<8x192xf32>
    %cst_55 = arith.constant 1.000000e+00 : f32
    %100 = vector.broadcast %cst_55 : f32 to vector<8x192xf32>
    %101 = arith.addf %100, %99 : vector<8x192xf32>
    %102 = math.log %101 : vector<8x192xf32>
    %103 = arith.addf %95, %102 : vector<8x192xf32>
    %cst_56 = arith.constant dense<0.000000e+00> : vector<8xf32>
    %104 = vector.multi_reduction <add>, %103, %cst_56 [1] : vector<8x192xf32> to vector<8xf32>
    %105 = vector.shape_cast %104 : vector<8xf32> to vector<8x1xf32>
    %106 = arith.mulf %105, %41 : vector<8x1xf32>
    %c0_57 = arith.constant 0 : index
    %c0_58 = arith.constant 0 : index
    %107 = vector.load %arg17[%c0_57, %c0_58] : memref<8x192xf32, #tpu.memory_space<vmem>>, vector<8x192xf32>
    tpu.vector_store %arg17[%c0_57, %c0_58], %81 {strides = array<i32>} : memref<8x192xf32, #tpu.memory_space<vmem>>, vector<8x192xf32>,
    %108 = vector.shape_cast %106 : vector<8x1xf32> to vector<1x8x1xf32>
    %cst_59 = arith.constant dense<0.000000e+00> : vector<1xf32>
    %109 = vector.multi_reduction <add>, %108, %cst_59 [1, 2] : vector<1x8x1xf32> to vector<1xf32>
    %110 = vector.shape_cast %109 : vector<1xf32> to vector<1x1x1xf32>
    %111 = vector.extract %110[0, 0, 0] : f32 from vector<1x1x1xf32>
    %112 = vector.broadcast %111 : f32 to vector<1x1xf32>
    %c0_60 = arith.constant 0 : index
    %c0_61 = arith.constant 0 : index
    %113 = vector.load %arg18[%c0_60, %c0_61] : memref<1x1xf32, #tpu.memory_space<vmem>>, vector<1x1xf32>
    tpu.vector_store %arg18[%c0_60, %c0_61], %112 {strides = array<i32>} : memref<1x1xf32, #tpu.memory_space<vmem>>, vector<1x1xf32>,
    %114 = vector.shape_cast %91 : vector<8x1xf32> to vector<1x8x1xf32>
    %cst_62 = arith.constant dense<0.000000e+00> : vector<1xf32>
    %115 = vector.multi_reduction <add>, %114, %cst_62 [1, 2] : vector<1x8x1xf32> to vector<1xf32>
    %116 = vector.shape_cast %115 : vector<1xf32> to vector<1x1x1xf32>
    %117 = vector.extract %116[0, 0, 0] : f32 from vector<1x1x1xf32>
    %118 = vector.broadcast %117 : f32 to vector<1x1xf32>
    %c0_63 = arith.constant 0 : index
    %c0_64 = arith.constant 0 : index
    %119 = vector.load %arg19[%c0_63, %c0_64] : memref<1x1xf32, #tpu.memory_space<vmem>>, vector<1x1xf32>
    tpu.vector_store %arg19[%c0_63, %c0_64], %118 {strides = array<i32>} : memref<1x1xf32, #tpu.memory_space<vmem>>, vector<1x1xf32>,
    return
  }
}

</mosaic_0001>

<bundles_post_ra>
// kernel: vae_forward.1
= control target key start
LH: loop header
LB: loop body
LE: loop exit
PB: predicated region body
PF: predicated region fallthrough
CT: control target
= control target key end

     0   :  { %s1389_s0 = inlined_call_operand.vmem [shape: f32[8,192], index: 0, kind: input, shape index: {}]   ;;  %s1390_s1 = inlined_call_operand.vmem [shape: f32[8,1], index: 1, kind: input, shape index: {}]   ;;  %s1391_s2 = inlined_call_operand.vmem [shape: f32[8,128], index: 2, kind: input, shape index: {}]   ;;  %s1392_s3 = inlined_call_operand.vmem [shape: bf16[192,64], index: 3, kind: input, shape index: {}]   ;;  %s1393_s4 = inlined_call_operand.vmem [shape: f32[1,64], index: 4, kind: input, shape index: {}]   ;;  %s1394_s5 = inlined_call_operand.vmem [shape: bf16[64,32], index: 5, kind: input, shape index: {}]   ;;  %s1395_s6 = inlined_call_operand.vmem [shape: f32[1,32], index: 6, kind: input, shape index: {}]   ;;  %s1396_s7 = inlined_call_operand.vmem [shape: f32[1,32], index: 7, kind: input, shape index: {}]   ;;  %s1397_s8 = inlined_call_operand.vmem [shape: f32[1,32], index: 8, kind: input, shape index: {}]   ;;  %s1398_s9 = inlined_call_operand.vmem [shape: bf16[32,256], index: 9, kind: input, shape index: {}]   ;;  %s1399_s10 = inlined_call_operand.vmem [shape: f32[1,256], index: 10, kind: input, shape index: {}]   ;;  %s1400_s11 = inlined_call_operand.vmem [shape: bf16[128,32], index: 11, kind: input, shape index: {}]   ;;  %s1401_s12 = inlined_call_operand.vmem [shape: f32[1,32], index: 12, kind: input, shape index: {}]   ;;  %s1402_s13 = inlined_call_operand.vmem [shape: bf16[32,64], index: 13, kind: input, shape index: {}]   ;;  %s1403_s14 = inlined_call_operand.vmem [shape: f32[1,64], index: 14, kind: input, shape index: {}]   ;;  %s1404_s15 = inlined_call_operand.vmem [shape: bf16[64,192], index: 15, kind: input, shape index: {}]   ;;  %s1405_s16 = inlined_call_operand.vmem [shape: f32[1,192], index: 16, kind: input, shape index: {}]   ;;  %s1406_s17 = inlined_call_operand.hbm [shape: f32[8,192], index: 17, kind: output, shape index: {0}]   ;;  %s1407_s18 = inlined_call_operand.hbm [shape: f32[1,1], index: 18, kind: output, shape index: {1}]   ;;  %s1408_s19 = inlined_call_operand.hbm [shape: f32[1,1], index: 19, kind: output, shape index: {2}]  }
   0x1   :  { %1411 = sst [smem:[#allocation9_spill]] %s1389_s0 }
   0x2   :  { %1412 = sst [smem:[#allocation10_spill]] %s1390_s1 }
   0x3   :  { %1413 = sst [smem:[#allocation11_spill]] %s1391_s2 }
   0x4   :  { %1414 = sst [smem:[#allocation12_spill]] %s1392_s3 }
   0x5   :  { %25 = vsyncpa [#allocation3], 0  ;;  %s1415_s20 = sld [smem:[#allocation12_spill]]  ;;  %v1054_v1 = vmov 0   ;;  %v1055_v3 = vmov 0.0   ;;  %vm178_vm0 = vcmask 523264  }
   0x6   :  { %182 = vmatprep.subr.bf16.mxu0 %v1054_v1  ;;  %884 = vmatprep.subr.bf16.mxu1 %v1055_v3  ;;  %s1416_s26 = sld [smem:[#allocation9_spill]]  ;;  %v946_v8 = vld [vmem:[%s1394_s5 + $0x18] sm:$0xff]   ;;  %v947_v10 = vld [vmem:[%s1394_s5 + $0x10] sm:$0xff]  }
   0x7   :  { %885 = vmatpush3.bf16.msra.mxu1 %v946_v8 }
   0x8   :  { %886 = vmatprep.subr.bf16.mxu1 %v1055_v3 }
   0xb   :  { %v934_v0 = vld [vmem:[%s1415_s20 + $0x38] sm:$0xff]   ;;  %v935_v2 = vld [vmem:[%s1415_s20 + $0x30] sm:$0xff]   ;;  %v936_v4 = vld [vmem:[%s1415_s20 + $0x28] sm:$0xff]   ;;  %887 = vmatpush3.bf16.msra.mxu1 %v947_v10 }
   0xc   :  { %183 = vmatpush1.bf16.msra.mxu0 %v934_v0  ;;  %v937_v5 = vld [vmem:[%s1415_s20 + $0x20] sm:$0xff]   ;;  %v1180_v6 = vld [vmem:[%s1416_s26 + $0x8] sm:$0xff]  ;;  %v938_v9 = vld [vmem:[%s1415_s20 + $0x18] sm:$0xff]   ;;  %888 = vmatprep.subr.bf16.mxu1 %v1055_v3 }
   0xd   :  { %184 = vmatprep.subr.bf16.mxu0 %v1054_v1  ;;  %v99_v7 = vpack.c.bf16 %v1180_v6, %v1180_v6  ;;  %v939_v11 = vld [vmem:[%s1415_s20 + $0x10] sm:$0xff]   ;;  %v940_v12 = vld [vmem:[%s1415_s20 + $0x8] sm:$0xff]   ;;  %v941_v13 = vld [vmem:[%s1415_s20] sm:$0xff]  }
   0xf   :  { %830 = vmatprep.mubr.msk.bf16.mxu0 %vm178_vm0, %v99_v7 }
  0x10   :  { %185 = vmatpush1.bf16.msra.mxu0 %v935_v2 }
  0x11   :  { %186 = vmatprep.subr.bf16.mxu0 %v1054_v1 }
  0x14   :  { %187 = vmatpush1.bf16.msra.mxu0 %v936_v4 }
  0x15   :  { %188 = vmatprep.subr.bf16.mxu0 %v1054_v1 }
  0x18   :  { %189 = vmatpush1.bf16.msra.mxu0 %v937_v5 }
  0x19   :  { %190 = vmatprep.subr.bf16.mxu0 %v1054_v1 }
  0x1c   :  { %191 = vmatpush1.bf16.msra.mxu0 %v938_v9 }
  0x1d   :  { %192 = vmatprep.subr.bf16.mxu0 %v1054_v1 }
  0x20   :  { %193 = vmatpush1.bf16.msra.mxu0 %v939_v11 }
  0x21   :  { %194 = vmatprep.subr.bf16.mxu0 %v1054_v1 }
  0x24   :  { %195 = vmatpush1.bf16.msra.mxu0 %v940_v12 }
  0x25   :  { %196 = vmatprep.subr.bf16.mxu0 %v1054_v1 }
  0x26   :  { %26 = vsyncpa [#allocation5], 0  ;;  %v942_v14 = vld [vmem:[%s1415_s20 + $0x58] sm:$0xff]   ;;  %v943_v15 = vld [vmem:[%s1415_s20 + $0x50] sm:$0xff]   ;;  %vm1056_vm1 = vmmov 0   ;;  %vm298_vm2 = vcmask 261120  }
  0x27   :  { %v944_v16 = vld [vmem:[%s1415_s20 + $0x48] sm:$0xff]   ;;  %v945_v17 = vld [vmem:[%s1415_s20 + $0x40] sm:$0xff]   ;;  %892 = vmatprep.mubr.msk.bf16.mxu1 %vm1056_vm1, %v1055_v3  ;;  %v952_v30 = vld [vmem:[%s1398_s9 + $0x14] ss:$8 sps:$4 sm:$0xff]   ;;  %vm750_vm3 = vcmask 7168   ;;  %s1057_s23 = smov [#allocation2]  }
  0x28   :  { %197 = vmatpush1.bf16.msra.mxu0 %v941_v13  ;;  %v1227_v18 = vld [vmem:[%s1416_s26] sm:$0xff]  ;;  %v948_v20 = vld [vmem:[%s1394_s5 + $0x8] sm:$0xff]   ;;  %v950_v31 = vld [vmem:[%s1398_s9 + $0x10] ss:$8 sps:$4 sm:$0xff]   ;;  %v377_v13 = vlaneseq  ;;  %s782_s24 = sshll.u32 %s1057_s23, 4  ;;  %s783_s24 = int_to_ptr.vmem [resolvable:$true] %s782_s24 }
  0x29   :  { %206 = vmatprep.subr.bf16.mxu0 %v1054_v1  ;;  %v98_v19 = vpack.c.bf16 %v1227_v18, %v1227_v18  ;;  %889 = vmatpush3.bf16.msra.mxu1 %v948_v20  ;;  %v949_v21 = vld [vmem:[%s1394_s5] sm:$0xff]   ;;  %v956_v4 = vld [vmem:[%s1400_s11 + $0x38] sm:$0xff]   ;;  %v957_v5 = vld [vmem:[%s1400_s11 + $0x30] sm:$0xff]   ;;  %s990_s20 = scalar_lea.vmem %s783_s24, 256  ;;  %p995_p1 = scmp.lt.s32.totalorder %s783_s24, %s783_s24 }
  0x2a   :  { %890 = vmatprep.subr.bf16.mxu1 %v1055_v3  ;;  %v817_v22 = vld [vmem:[%s1393_s4] ss:$0 sm:$0xff]  ;;  %v955_v32 = vld [vmem:[%s1398_s9 + $0x4] ss:$8 sps:$4 sm:$0xff]   ;;  %v960_v9 = vld [vmem:[%s1400_s11 + $0x18] sm:$0xff]   ;;  %p991_p0 = scmp.ne.s32.totalorder %s783_s24, %s990_s20  ;;  %p996_p2 = scmp.lt.s32.totalorder %s990_s20, %s990_s20 }
  0x2b   :  { %v953_v33 = vld [vmem:[%s1398_s9] ss:$8 sps:$4 sm:$0xff]   ;;  %v961_v10 = vld [vmem:[%s1400_s11 + $0x10] sm:$0xff]   ;;  %s1417_s9 = sld [smem:[#allocation11_spill]] }
  0x2c   :  { %207 = vmatpush2.bf16.msra.mxu0 %v942_v14  ;;  %v831_v34 = vld [vmem:[%s1395_s6] ss:$0 sm:$0xff]  ;;  %v958_v7 = vld [vmem:[%s1400_s11 + $0x28] sm:$0xff]   ;;  %v1306_v14 = vshrl.u32 %v377_v13, 7  ;;  %p997_p3 = por %p996_p2, %p995_p1 }
  0x2d   :  { %208 = vmatprep.subr.bf16.mxu0 %v1054_v1  ;;  %891 = vmatpush3.bf16.msra.mxu1 %v949_v21  ;;  %v837_v60 = vld [vmem:[%s1396_s7] ss:$0 sm:$0xff]  ;;  %v962_v11 = vld [vmem:[%s1400_s11 + $0x8] sm:$0xff]  }
  0x2e   :  { %422 = vmatprep.subr.bf16.mxu1 %v952_v30  ;;  %v838_v63 = vld [vmem:[%s1397_s8] ss:$0 sm:$0xff]  ;;  %p998_p4 = pnand %p997_p3, %p991_p0 }
  0x2f   :  { %v959_v8 = vld [vmem:[%s1400_s11 + $0x20] sm:$0xff]  }
  0x30   :  { %209 = vmatpush2.bf16.msra.mxu0 %v943_v15  ;;  %v963_v12 = vld [vmem:[%s1400_s11] sm:$0xff]   ;;  %v379_v15 = vsub.s32 0, %v1306_v14 }
  0x31   :  { %210 = vmatprep.subr.bf16.mxu0 %v1054_v1 }
  0x34   :  { %211 = vmatpush2.bf16.msra.mxu0 %v944_v16  ;;  %v383_v16 = vsub.s32 1, %v1306_v14 }
  0x35   :  { %212 = vmatprep.subr.bf16.mxu0 %v1054_v1 }
  0x38   :  { %213 = vmatpush2.bf16.msra.mxu0 %v945_v17  ;;  %v343_v17 = vld [vmem:[%s1399_s10] sm:$0x3] }
  0x39   :  { %v384_v20 = vrot.slane %v343_v17, %v383_v16 }
  0x3b   :  { %215 = vmatmul.mubr.bf16.vlgmr.msra.gmra.mxu0 %v98_v19  ;;  %v380_v19 = vrot.slane %v343_v17, %v379_v15 }
  0x3c   :  { %704 = vmatprep.mubr.bf16.mxu0 %v1054_v1 }
  0xfb   :  { %v216_v23 = vpop.f32.mrf.mxu0 }
  0xfc   :  { %v217_v24 = vadd.f32 %v817_v22, %v216_v23 }
  0xfd   :  { %v218_v25 = vpop.f32.mrf.mxu0 }
  0xfe   :  { %v222_v26 = vmax.f32 %v217_v24, 0.0 }
  0xff   :  { %v219_v27 = vpop.f32.mrf.mxu0 }
 0x100   :  { %v223_v28 = vpack.c.bf16 %v222_v26, %v222_v26 }
 0x101   :  { %v220_v29 = vpop.f32.mrf.mxu0 }
 0x102   :  { %893 = vmatmul.mubr.msk.bf16.vlgmr.msra.gmra.mxu1 %vm178_vm0, %v223_v28 }
 0x103   :  { %442 = vmatprep.mubr.bf16.mxu1 %v1054_v1  ;;  %423 = vmatpush1.bf16.msra.mxu1 %v950_v31 }
 0x104   :  { %424 = vmatprep.subr.bf16.mxu1 %v955_v32 }
 0x107   :  { %425 = vmatpush1.bf16.msra.mxu1 %v953_v33  ;;  %v338_v33 = vld [vmem:[%s1417_s9] sm:$0xff] }
 0x108   :  { %896 = vmatprep.subr.bf16.mxu1 %v1055_v3 }
 0x1c2   :  { %v291_v35 = vpop.f32.mrf.mxu1 }
 0x1c3   :  { %v292_v36 = vadd.f32 %v831_v34, %v291_v35 }
 0x1c4   :  { %v894_v37 = vpop.f32.mrf.mxu1 }
 0x1c5   :  { %v297_v38 = vmax.f32 %v292_v36, 0.0 }
 0x1c6   :  { %v294_v39 = vpop.f32.mrf.mxu1 }
 0x1c7   :  { %v299_v40 = vsel %vm298_vm2, %v297_v38, 0.0  ;;  %v964_v39 = vld [vmem:[%s1402_s13 + $0x8] sm:$0xff]  }
 0x1c8   :  { %v300_v41 = vrot.slane %v299_v40, 4  ;;  %v895_v42 = vpop.f32.mrf.mxu1 }
 0x1c9   :  { %v966_v42 = vld [vmem:[%s1404_s15 + $0x30] ss:$8 sps:$4 sm:$0xff]  }
 0x1ca   :  { %v301_v43 = vadd.f32 %v300_v41, %v299_v40  ;;  %v965_v41 = vld [vmem:[%s1402_s13] sm:$0xff]  }
 0x1cc   :  { %v302_v44 = vrot.slane %v301_v43, 2 }
 0x1ce   :  { %v303_v45 = vadd.f32 %v302_v44, %v301_v43  ;;  %v968_v43 = vld [vmem:[%s1404_s15 + $0x34] ss:$8 sps:$4 sm:$0xff]   ;;  %v971_v44 = vld [vmem:[%s1404_s15 + $0x24] ss:$8 sps:$4 sm:$0xff]  }
 0x1cf   :  { %680 = vmatprep.subr.bf16.mxu0 %v968_v43 }
 0x1d0   :  { %v304_v46 = vrot.slane %v303_v45, 1  ;;  %681 = vmatpush1.bf16.msra.mxu0 %v966_v42 }
 0x1d1   :  { %682 = vmatprep.subr.bf16.mxu0 %v971_v44 }
 0x1d2   :  { %v305_v47 = vadd.f32 %v304_v46, %v303_v45  ;;  %v974_v45 = vld [vmem:[%s1404_s15 + $0x14] ss:$8 sps:$4 sm:$0xff]   ;;  %v972_v46 = vld [vmem:[%s1404_s15 + $0x10] ss:$8 sps:$4 sm:$0xff]  }
 0x1d4   :  { %v307_v48 = vmul.f32 0.125, %v305_v47  ;;  %v845_v47 = vld [vmem:[%s1401_s12] ss:$0 sm:$0xff] }
 0x1d6   :  { %v308_v49 = vsub.f32 %v297_v38, %v307_v48 }
 0x1d8   :  { %v309_v50 = vmul.f32 %v308_v49, %v308_v49  ;;  %v325_v61 = vmul.f32 %v837_v60, %v308_v49 }
 0x1da   :  { %v310_v51 = vsel %vm298_vm2, %v309_v50, 0.0 }
 0x1db   :  { %v311_v52 = vrot.slane %v310_v51, 4 }
 0x1dd   :  { %v312_v53 = vadd.f32 %v311_v52, %v310_v51 }
 0x1df   :  { %v313_v54 = vrot.slane %v312_v53, 2 }
 0x1e1   :  { %v314_v55 = vadd.f32 %v313_v54, %v312_v53 }
 0x1e3   :  { %v315_v56 = vrot.slane %v314_v55, 1 }
 0x1e5   :  { %v316_v57 = vadd.f32 %v315_v56, %v314_v55  ;;  %v977_v55 = vld [vmem:[%s1404_s15 + $0x4] ss:$8 sps:$4 sm:$0xff]   ;;  %v975_v56 = vld [vmem:[%s1404_s15] ss:$8 sps:$4 sm:$0xff]  }
 0x1e7   :  { %v317_v58 = vmul.f32 0.125, %v316_v57  ;;  %v854_v57 = vld [vmem:[%s1403_s14] ss:$0 sm:$0xff] }
 0x1e9   :  { %v326_v59 = vadd.f32 1e-05, %v317_v58 }
 0x1eb   :  { %978 = vrsqrt.f32 %v326_v59 }
 0x1f8   :  { %v979_v62 = vpop.eup %978 }
 0x1f9   :  { %v328_v0 = vmul.f32 %v979_v62, %v325_v61 }
 0x1fb   :  { %v336_v1 = vadd.f32 %v838_v63, %v328_v0 }
 0x1fd   :  { %v375_v2 = vpack.c.bf16 %v336_v1, %v336_v1  ;;  %v374_v1 = vld [vmem:[%s1405_s16] sm:$0x3]  ;;  %s1418_s16 = sld [smem:[#allocation10_spill]] }
 0x1ff   :  { %843 = vmatmul.mubr.msk.bf16.vlgmr.msra.gmra.mxu1 %vm298_vm2, %v375_v2  ;;  %v622_v2 = vrot.slane %v374_v1, %v379_v15 }
 0x200   :  { %912 = vmatprep.mubr.msk.bf16.mxu1 %vm1056_vm1, %v1055_v3  ;;  %897 = vmatpush3.bf16.msra.mxu1 %v956_v4  ;;  %v626_v4 = vrot.slane %v374_v1, %v383_v16 }
 0x201   :  { %898 = vmatprep.subr.bf16.mxu1 %v1055_v3 }
 0x204   :  { %899 = vmatpush3.bf16.msra.mxu1 %v957_v5 }
 0x205   :  { %900 = vmatprep.subr.bf16.mxu1 %v1055_v3 }
 0x208   :  { %901 = vmatpush3.bf16.msra.mxu1 %v958_v7 }
 0x209   :  { %902 = vmatprep.subr.bf16.mxu1 %v1055_v3 }
 0x20c   :  { %903 = vmatpush3.bf16.msra.mxu1 %v959_v8 }
 0x20d   :  { %904 = vmatprep.subr.bf16.mxu1 %v1055_v3 }
 0x210   :  { %905 = vmatpush3.bf16.msra.mxu1 %v960_v9 }
 0x211   :  { %906 = vmatprep.subr.bf16.mxu1 %v1055_v3 }
 0x214   :  { %907 = vmatpush3.bf16.msra.mxu1 %v961_v10 }
 0x215   :  { %908 = vmatprep.subr.bf16.mxu1 %v1055_v3 }
 0x218   :  { %909 = vmatpush3.bf16.msra.mxu1 %v962_v11 }
 0x219   :  { %910 = vmatprep.subr.bf16.mxu1 %v1055_v3 }
 0x21c   :  { %911 = vmatpush3.bf16.msra.mxu1 %v963_v12 }
 0x21d   :  { %916 = vmatprep.subr.bf16.mxu1 %v1055_v3 }
 0x2bf   :  { %v444_v21 = vpop.f32.mrf.mxu1 }
 0x2c0   :  { %v445_v23 = vadd.f32 %v444_v21, %v380_v19 }
 0x2c1   :  { %v446_v22 = vpop.f32.mrf.mxu1 }
 0x2c2   :  { %v447_v24 = vadd.f32 %v446_v22, %v384_v20  ;;  %v714_v28 = vmul.f32 %v445_v23, %v445_v23 }
 0x2c3   :  { %v448_v25 = vpop.f32.mrf.mxu1 }
 0x2c4   :  { %v844_v26 = vclamps-f32 %v447_v24, 16.0 }
 0x2c5   :  { %v449_v27 = vpop.f32.mrf.mxu1 }
 0x2c6   :  { %v453_v29 = vmul.f32 0.5, %v844_v26  ;;  %v713_v30 = vadd.f32 1.0, %v844_v26 }
 0x2c8   :  { %v454_v31 = vmul.f32 1.442695, %v453_v29  ;;  %v715_v32 = vsub.f32 %v713_v30, %v714_v28 }
 0x2ca   :  { %980 = vpow2.f32 %v454_v31 }
 0x2d7   :  { %v981_v34 = vpop.eup %980 }
 0x2d8   :  { %v456_v35 = vmul.f32 %v981_v34, %v338_v33  ;;  %v716_v36 = vmul.f32 %v981_v34, %v981_v34 }
 0x2da   :  { %v457_v37 = vadd.f32 %v456_v35, %v445_v23  ;;  %v1320_v38 = vsub.f32 %v715_v32, %v716_v36 }
 0x2dc   :  { %v458_v40 = vpack.c.bf16 %v457_v37, %v457_v37 }
 0x2de   :  { %913 = vmatmul.mubr.bf16.vlgmr.msra.gmra.mxu1 %v458_v40 }
 0x2df   :  { %917 = vmatpush3.bf16.msra.mxu1 %v964_v39  ;;  %920 = vmatprep.mubr.msk.bf16.mxu1 %vm1056_vm1, %v1055_v3 }
 0x2e0   :  { %918 = vmatprep.subr.bf16.mxu1 %v1055_v3  ;;  %v969_v3 = vld [vmem:[%s1404_s15 + $0x20] ss:$8 sps:$4 sm:$0xff]  }
 0x2e1   :  { %683 = vmatpush1.bf16.msra.mxu0 %v969_v3 }
 0x2e2   :  { %684 = vmatprep.subr.bf16.mxu0 %v974_v45 }
 0x2e3   :  { %919 = vmatpush3.bf16.msra.mxu1 %v965_v41 }
 0x2e5   :  { %685 = vmatpush1.bf16.msra.mxu0 %v972_v46 }
 0x2e6   :  { %686 = vmatprep.subr.bf16.mxu0 %v977_v55 }
 0x2e9   :  { %687 = vmatpush1.bf16.msra.mxu0 %v975_v56 }
 0x39e   :  { %v547_v48 = vpop.f32.mrf.mxu1 }
 0x39f   :  { %v548_v49 = vadd.f32 %v845_v47, %v547_v48 }
 0x3a0   :  { %v914_v50 = vpop.f32.mrf.mxu1 }
 0x3a1   :  { %v553_v51 = vmax.f32 %v548_v49, 0.0 }
 0x3a2   :  { %v550_v52 = vpop.f32.mrf.mxu1 }
 0x3a3   :  { %v554_v53 = vpack.c.bf16 %v553_v51, %v553_v51 }
 0x3a4   :  { %v915_v54 = vpop.f32.mrf.mxu1 }
 0x3a5   :  { %921 = vmatmul.mubr.msk.bf16.vlgmr.msra.gmra.mxu1 %vm298_vm2, %v554_v53 }
 0x465   :  { %v610_v58 = vpop.f32.mrf.mxu1 }
 0x466   :  { %v611_v59 = vadd.f32 %v854_v57, %v610_v58 }
 0x467   :  { %v922_v60 = vpop.f32.mrf.mxu1 }
 0x468   :  { %v616_v61 = vmax.f32 %v611_v59, 0.0 }
 0x469   :  { %v613_v62 = vpop.f32.mrf.mxu1 }
 0x46a   :  { %v617_v63 = vpack.c.bf16 %v616_v61, %v616_v61 }
 0x46b   :  { %v923_v0 = vpop.f32.mrf.mxu1 }
 0x46c   :  { %866 = vmatmul.mubr.msk.bf16.vlgmr.msra.gmra.mxu0 %vm178_vm0, %v617_v63 }
 0x52c   :  { %v706_v5 = vpop.f32.mrf.mxu0 }
 0x52d   :  { %v707_v7 = vadd.f32 %v706_v5, %v622_v2 }
 0x52e   :  { %v708_v8 = vpop.f32.mrf.mxu0 }
 0x52f   :  { %v727_v9 = vand.u32 2147483647, %v707_v7  ;;  %748 = vst [vmem:[#allocation2] sm:$0xff] %v707_v7  ;;  %v709_v10 = vadd.f32 %v708_v8, %v626_v4  ;;  %v721_v26 = vmax.f32 %v707_v7, 0.0  ;;  %v723_v27 = vmul.f32 %v707_v7, %v1227_v18 }
 0x530   :  { %v710_v11 = vpop.f32.mrf.mxu0 }
 0x531   :  { %v729_v12 = vsub.f32 0.0, %v727_v9  ;;  %v728_v13 = vand.u32 2147483647, %v709_v10  ;;  %749 = vst.msk [vmem:[#allocation2 + $0x8] sm:$0xff] %vm178_vm0, %v709_v10  ;;  %v722_v23 = vmax.f32 %v709_v10, 0.0  ;;  %v724_v24 = vmul.f32 %v709_v10, %v1180_v6  ;;  %v337_v6 = vld [vmem:[%s1418_s16] sm:$0xff] }
 0x532   :  { %v711_v17 = vpop.f32.mrf.mxu0  ;;  %v725_v32 = vsub.f32 %v721_v26, %v723_v27 }
 0x533   :  { %v731_v19 = vmul.f32 1.442695, %v729_v12  ;;  %v730_v20 = vsub.f32 0.0, %v728_v13  ;;  %v726_v30 = vsub.f32 %v722_v23, %v724_v24 }
 0x535   :  { %982 = vpow2.f32 %v731_v19  ;;  %v733_v21 = vmul.f32 1.442695, %v730_v20 }
 0x537   :  { %984 = vpow2.f32 %v733_v21 }
 0x542   :  { %v983_v15 = vpop.eup %982 }
 0x543   :  { %v735_v14 = vadd.f32 1.0, %v983_v15 }
 0x544   :  { %v985_v16 = vpop.eup %984 }
 0x545   :  { %v736_v22 = vadd.f32 1.0, %v985_v16  ;;  %986 = vlog2.f32 %v735_v14 }
 0x547   :  { %988 = vlog2.f32 %v736_v22 }
 0x552   :  { %v987_v25 = vpop.eup %986 }
 0x553   :  { %v738_v29 = vmul.f32 0.6931472, %v987_v25 }
 0x554   :  { %v989_v28 = vpop.eup %988 }
 0x555   :  { %v740_v31 = vmul.f32 0.6931472, %v989_v28  ;;  %v741_v34 = vadd.f32 %v738_v29, %v725_v32 }
 0x557   :  { %v742_v33 = vadd.f32 %v740_v31, %v726_v30 }
 0x559   :  { %v743_v35 = vsel %vm178_vm0, %v742_v33, 0.0 }
 0x55a   :  { %v744_v36 = vadd.f32 %v743_v35, %v741_v34 }
 0x55c   :  { %745 = vadd.xlane.f32.xlu0 %v744_v36 }
 0x560   :  { %718 = vadd.xlane.f32.xlu0 %v1320_v38 }
 0x5e5   :  { %v746_v37 = vpop.xlane.xlu0 %745 }
 0x5e6   :  { %v747_v18 = vmul.f32 %v746_v37, %v337_v6 }
 0x5e8   :  { %v751_v39 = vsel %vm750_vm3, %v747_v18, 0.0 }
 0x5e9   :  { %752 = vadd.xlane.f32.xlu1 %v751_v39  ;;  %v719_v40 = vpop.xlane.xlu0 %718 }
 0x5ea   :  { %v720_v41 = vmul.f32 -0.5, %v719_v40 }
 0x5ec   :  { %v764_v42 = vsel %vm750_vm3, %v720_v41, 0.0 }
 0x5ed   :  { %765 = vadd.xlane.f32.xlu1 %v764_v42 }
 0x5ee   :  { %1001 = shalt.err (!%p998_p4)
}
 0x5ef   :  { %785 = dma.vmem_to_hbm [thread:$0]  %s783_s24, 256, %s1406_s17, [#allocation3]   ;;  %vm762_vm4 = vcmask 0  }
 0x5f0   :  { %s1058_s8 = smov [#allocation4]   ;;  %s1059_s3 = smov [#allocation6]  }
 0x5f1   :  { %s792_s26 = sshll.u32 %s1058_s8, 4  ;;  %s802_s5 = sshll.u32 %s1059_s3, 4  ;;  %s793_s26 = int_to_ptr.vmem [resolvable:$true] %s792_s26  ;;  %s803_s5 = int_to_ptr.vmem [resolvable:$true] %s802_s5 }
 0x5f2   :  { %s1010_s27 = scalar_lea.vmem %s793_s26, 16  ;;  %s1014_s28 = scalar_lea.vmem %s793_s26, 32 }
 0x5f3   :  { %p1011_p5 = scmp.ne.s32.totalorder %s793_s26, %s1010_s27  ;;  %p1015_p6 = scmp.lt.s32.totalorder %s793_s26, %s793_s26 }
 0x5f4   :  { %p1016_p7 = scmp.lt.s32.totalorder %s1014_s28, %s1010_s27 }
 0x5f6   :  { %p1017_p8 = por %p1016_p7, %p1015_p6 }
 0x5f8   :  { %p1018_p9 = pnand %p1017_p8, %p1011_p5 }
 0x672   :  { %v753_v38 = vpop.xlane.xlu1 %752 }
 0x673   :  { %v754_v43 = vrot.slane %v753_v38, 4 }
 0x675   :  { %v755_v44 = vadd.f32 %v754_v43, %v753_v38 }
 0x676   :  { %v766_v3 = vpop.xlane.xlu1 %765 }
 0x677   :  { %v756_v45 = vrot.slane %v755_v44, 2  ;;  %v767_v46 = vrot.slane %v766_v3, 4 }
 0x679   :  { %v768_v47 = vadd.f32 %v767_v46, %v766_v3  ;;  %v757_v48 = vadd.f32 %v756_v45, %v755_v44 }
 0x67b   :  { %v769_v49 = vrot.slane %v768_v47, 2  ;;  %v758_v50 = vrot.slane %v757_v48, 1 }
 0x67d   :  { %v770_v51 = vadd.f32 %v769_v49, %v768_v47  ;;  %v759_v52 = vadd.f32 %v758_v50, %v757_v48 }
 0x67f   :  { %924 = vpush %v759_v52  ;;  %v771_v53 = vrot.slane %v770_v51, 1 }
 0x681   :  { %v772_v54 = vadd.f32 %v771_v53, %v770_v51 }
 0x683   :  { %926 = vpush %v772_v54 }
 0x6b0   :  { %s925_s17 = spop %924 }
 0x6b1   :  { %v761_v55 = vstv %s925_s17 }
 0x6b2   :  { %763 = vst.msk [vmem:[#allocation4] sm:$0x1] %vm762_vm4, %v761_v55 }
 0x6b3   :  { %1021 = shalt.err (!%p1018_p9)
}
 0x6b4   :  { %795 = dma.vmem_to_hbm [thread:$0]  %s793_s26, 16, %s1407_s18, [#allocation5]  }
 0x6b5   :  { %s927_s4 = spop %926  ;;  %s1030_s0 = scalar_lea.vmem %s803_s5, 16 }
 0x6b6   :  { %v774_v56 = vstv %s927_s4  ;;  %p1031_p10 = scmp.ne.s32.totalorder %s803_s5, %s1030_s0  ;;  %s1034_s30 = scalar_lea.vmem %s803_s5, 32 }
 0x6b7   :  { %775 = vst.msk [vmem:[#allocation6] sm:$0x1] %vm762_vm4, %v774_v56  ;;  %p1035_p11 = scmp.lt.s32.totalorder %s803_s5, %s803_s5  ;;  %p1036_p12 = scmp.lt.s32.totalorder %s1034_s30, %s1030_s0 }
 0x6b9   :  { %p1037_p13 = por %p1036_p12, %p1035_p11 }
 0x6bb   :  { %p1038_p0 = pnand %p1037_p13, %p1031_p10 }
 0x6bd   :  { %1041 = shalt.err (!%p1038_p0)
}
 0x6be   :  { %805 = dma.vmem_to_hbm [thread:$0]  %s803_s5, 16, %s1408_s19, [#allocation5]  }
 0x6bf   :  { %1050 = dma.done.wait [#allocation3], 256  }
 0x6c0   :  { %1051 = vsyncadd [#allocation3], 4294967040 }
 0x6c1   :  { %1052 = dma.done.wait [#allocation5], 32  }
 0x6c2   :  { %1053 = vsyncadd [#allocation5], 4294967264 }
 0x6c3   :  { %815 = vsyncpa [#allocation3], 1 }
 0x6c4   :  { %816 = vsyncpa [#allocation5], 1 }

</bundles_post_ra>
